<compile_context>
chip_gen: v6e
topology: v6e:2x2x1
jax: 0.10.0
libtpu: 0.0.40
codegen_flags: <defaults>
</compile_context>

<pallas_src>
import jax
import jax.numpy as jnp
from jax import lax
from jax.experimental import pallas as pl
from jax.experimental.pallas import tpu as pltpu

_LANES = 128
_SUBLANES = 8
_CHUNK_ROWS = 256        # 256x128 f32 chunk = 32 vregs per operand; no spill pressure


def _round_up(x, m):
    return ((x + m - 1) // m) * m


def _tpu_caps():
    """(max_block_rows, num_core_splits) per chip generation; conservative fallback."""
    max_rows, splits = 4096, 1
    try:
        kind = jax.devices()[0].device_kind.lower()
    except Exception:
        return max_rows, splits
    if ("v5 lite" in kind) or ("v5e" in kind) or ("v5lite" in kind):
        return 4096, 1        # 16 MiB default scoped VMEM: 2 MiB tile x 2 in x 2 buf = 8 MiB
    if "v6" in kind:
        return 8192, 1        # 32 MiB scoped: 4 MiB tile x 2 in x 2 buf = 16 MiB
    if "v7" in kind:
        return 8192, 2        # shard row blocks across the 2 TensorCores
    return max_rows, splits


def _sq_diff_sum_kernel(a_ref, b_ref, out_ref):
    """out[0] (8,128) += per-lane partial sum of (a - b)^2 over this row block."""
    k = pl.program_id(1)     # reduction axis ("arbitrary")

    @pl.when(k == 0)
    def _():
        out_ref[...] = jnp.zeros_like(out_ref)

    block_rows = a_ref.shape[0]
    chunk = min(_CHUNK_ROWS, block_rows)
    n_chunks = block_rows // chunk

    def body(c, acc):
        r0 = pl.multiple_of(c * chunk, chunk)
        a = a_ref[pl.ds(r0, chunk), :].astype(jnp.float32)
        b = b_ref[pl.ds(r0, chunk), :].astype(jnp.float32)
        d = a - b
        # (chunk,128) -> (chunk//8, 8, 128) -> (8,128): pure VPU vreg adds, no XLU.
        return acc + jnp.sum((d * d).reshape(-1, _SUBLANES, _LANES), axis=0)

    init = jnp.zeros((_SUBLANES, _LANES), jnp.float32)
    if n_chunks == 1:
        partial = body(0, init)
    else:
        partial = lax.fori_loop(0, n_chunks, body, init, unroll=min(n_chunks, 8))

    out_ref[0] += partial


def pallas_sq_diff_sum(a, b):
    """sum((a - b)^2) as a single bandwidth-bound Pallas reduction; returns f32 scalar."""
    assert a.size == b.size, "pair tensors must have the same number of elements"
    size = int(a.size)
    max_rows, core_splits = _tpu_caps()

    # Sublane multiple for the packed layout of the narrowest dtype in the pair.
    def smult(dt):
        return _SUBLANES * max(1, 4 // jnp.dtype(dt).itemsize)
    row_mult = max(smult(a.dtype), smult(b.dtype))

    natural_rows = max(1, -(-size // _LANES))
    rows = _round_up(natural_rows, row_mult)

    if rows > max_rows:
        block_rows = max_rows                        # multiple of _CHUNK_ROWS
    elif rows > _CHUNK_ROWS:
        block_rows = _round_up(rows, _CHUNK_ROWS)    # <= max_rows (max_rows % 256 == 0)
    else:
        block_rows = rows                            # single-chunk small block

    padded_rows = _round_up(rows, block_rows)
    num_blocks = padded_rows // block_rows

    # Only split across cores when it costs nothing (even block count, >1 block).
    num_splits = core_splits if (num_blocks >= core_splits and
                                 num_blocks % core_splits == 0) else 1
    blocks_per_split = num_blocks // num_splits

    def to_slab(x):
        flat = jnp.ravel(x)                          # contiguous: metadata-only
        need = padded_rows * _LANES
        if flat.shape[0] != need:
            flat = jnp.pad(flat, (0, need - flat.shape[0]))   # only ragged tails copy
        return flat.reshape(padded_rows, _LANES)

    a_slab = to_slab(a)
    b_slab = to_slab(b)

    total = padded_rows * _LANES
    bytes_accessed = (total * (jnp.dtype(a.dtype).itemsize + jnp.dtype(b.dtype).itemsize)
                      + num_splits * _SUBLANES * _LANES * 4)
    cost = pl.CostEstimate(flops=3 * total, transcendentals=0,
                           bytes_accessed=bytes_accessed)

    out = pl.pallas_call(
        _sq_diff_sum_kernel,
        out_shape=jax.ShapeDtypeStruct((num_splits, _SUBLANES, _LANES), jnp.float32),
        grid_spec=pltpu.PrefetchScalarGridSpec(
            num_scalar_prefetch=0,
            grid=(num_splits, blocks_per_split),
            in_specs=[
                pl.BlockSpec((block_rows, _LANES),
                             lambda s, k, n=blocks_per_split: (s * n + k, 0)),
                pl.BlockSpec((block_rows, _LANES),
                             lambda s, k, n=blocks_per_split: (s * n + k, 0)),
            ],
            out_specs=pl.BlockSpec((1, _SUBLANES, _LANES), lambda s, k: (s, 0, 0)),
        ),
        compiler_params=pltpu.CompilerParams(
            dimension_semantics=("parallel", "arbitrary"),
        ),
        cost_estimate=cost,
    )(a_slab, b_slab)

    # Single cross-lane/sublane reduce, done once on the tiny lane-dense output.
    return jnp.sum(out)


class Constants:
    # Synthetic stand-in for misc.crit Constants.mapping
    mapping = {"mse": ("sources1", "sources2")}


class CritBase:
    """JAX/Pallas port of CritBase with a concrete squared-error _step."""

    def __init__(self, crit_name="mse", weights=1.0, batch_mean=True):
        assert crit_name in Constants.mapping.keys()
        self.keys = Constants.mapping[crit_name]
        self.weights = weights
        self.batch_mean = batch_mean

    def _step(self, index, src1, src2, *others):
        # TODO(synk): CritBase._step is abstract in the original module; instantiated
        # here as sum of squared differences (the reduction hot path).
        return pallas_sq_diff_sum(src1, src2)

    def forward(self, kwargs):
        sources1, sources2, *others = [kwargs[key] for key in self.keys]
        if not isinstance(sources1, list):
            sources1 = [sources1]
        if not isinstance(sources2, list):
            sources2 = [sources2] * len(sources1)
        else:
            assert len(sources1) == len(sources2)
        # Do not mutate self.weights (avoids stateful surprise under jit/retracing).
        weights = (self.weights if isinstance(self.weights, list)
                   else [self.weights] * len(sources1))
        assert len(sources1) == len(weights)

        dinominator = float(sources1[0].shape[0]) if self.batch_mean else 1.0

        loss = None
        for i, (weight, src1, src2) in enumerate(zip(weights, sources1, sources2)):
            term = weight * self._step(i, src1, src2, *others) / dinominator
            loss = term if loss is None else loss + term

        # TODO(synk): `loss_result` is undefined in the original forward (bug in the
        # reference snippet); we treat it as the accumulated loss.
        loss_result = loss
        return (loss_result, loss, loss_result - loss, dinominator)


if __name__ == "__main__":
    key = jax.random.PRNGKey(0)
    k1, k2, k3 = jax.random.split(key, 3)

    # NCHW-style inputs, as a torch criterion would receive them.
    x1 = jax.random.normal(k1, (2, 4, 16, 16), dtype=jnp.float32)
    x2 = jax.random.normal(k2, (2, 4, 16, 16), dtype=jnp.float32)
    # Second source pair (list form), seq-style tensor kept in native bf16 in HBM.
    y1 = jax.random.normal(k3, (2, 8, 32), dtype=jnp.bfloat16)
    y2 = jnp.zeros_like(y1)

    crit = CritBase("mse", weights=[1.0, 0.5], batch_mean=True)
    kwargs = {"sources1": [x1, y1], "sources2": [x2, y2]}

    loss_result, loss, diff, denom = crit.forward(kwargs)
    jax.block_until_ready(loss)

    # Reference check in plain JAX (kernel casts to f32 in-register, so ref does too).
    ref = (1.0 * jnp.sum((x1 - x2) ** 2)
           + 0.5 * jnp.sum((y1.astype(jnp.float32) - y2.astype(jnp.float32)) ** 2)) / 2.0
    assert jnp.allclose(loss, ref, rtol=1e-5, atol=1e-5), (loss, ref)
    assert float(diff) == 0.0
    assert denom == 2.0

    print("KERNEL_OK")
</pallas_src>

<mosaic_0001>
module attributes {stable_mosaic.version = 11 : i64} {
  func.func @_sq_diff_sum_kernel(%arg0: i32, %arg1: i32, %arg2: memref<16x128xf32, #tpu.memory_space<vmem>>, %arg3: memref<16x128xf32, #tpu.memory_space<vmem>>, %arg4: memref<1x8x128xf32, #tpu.memory_space<vmem>>) attributes {dimension_semantics = [#tpu.dimension_semantics<parallel>, #tpu.dimension_semantics<arbitrary>], iteration_bounds = array<i64: 1, 1>, scalar_prefetch = 0 : i64, scratch_operands = 0 : i64, tpu.core_type = #tpu.core_type<tc>, window_params = [{transform_indices = @transform_0, window_bounds = array<i64: 16, 128>}, {transform_indices = @transform_1, window_bounds = array<i64: 16, 128>}, {transform_indices = @transform_2, window_bounds = array<i64: 1, 8, 128>}]} {
    %c0_i32 = arith.constant 0 : i32
    %0 = arith.cmpi eq, %arg1, %c0_i32 : i32
    %1 = arith.extui %0 : i1 to i32
    %c0_i32_0 = arith.constant 0 : i32
    %2 = arith.cmpi ne, %1, %c0_i32_0 : i32
    scf.if %2 {
      %cst_10 = arith.constant 0.000000e+00 : f32
      %20 = vector.broadcast %cst_10 : f32 to vector<1x8x128xf32>
      %c0_11 = arith.constant 0 : index
      %c0_12 = arith.constant 0 : index
      %c0_13 = arith.constant 0 : index
      %21 = vector.load %arg4[%c0_11, %c0_12, %c0_13] : memref<1x8x128xf32, #tpu.memory_space<vmem>>, vector<1x8x128xf32>
      tpu.vector_store %arg4[%c0_11, %c0_12, %c0_13], %20 {strides = array<i32>} : memref<1x8x128xf32, #tpu.memory_space<vmem>>, vector<1x8x128xf32>,
    } else {
    }
    %cst = arith.constant 0.000000e+00 : f32
    %3 = vector.broadcast %cst : f32 to vector<8x128xf32>
    %c0_i32_1 = arith.constant 0 : i32
    %4 = tpu.assume_multiple %c0_i32_1, 16 : i32
    %5 = arith.index_cast %4 : i32 to index
    %c0 = arith.constant 0 : index
    %6 = vector.load %arg2[%5, %c0] : memref<16x128xf32, #tpu.memory_space<vmem>>, vector<16x128xf32>
    %7 = arith.index_cast %4 : i32 to index
    %c0_2 = arith.constant 0 : index
    %8 = vector.load %arg3[%7, %c0_2] : memref<16x128xf32, #tpu.memory_space<vmem>>, vector<16x128xf32>
    %9 = arith.subf %6, %8 : vector<16x128xf32>
    %10 = arith.mulf %9, %9 : vector<16x128xf32>
    %11 = vector.shape_cast %10 : vector<16x128xf32> to vector<2x8x128xf32>
    %cst_3 = arith.constant dense<0.000000e+00> : vector<8x128xf32>
    %12 = vector.multi_reduction <add>, %11, %cst_3 [0] : vector<2x8x128xf32> to vector<8x128xf32>
    %13 = arith.addf %3, %12 : vector<8x128xf32>
    %c0_4 = arith.constant 0 : index
    %c0_5 = arith.constant 0 : index
    %c0_6 = arith.constant 0 : index
    %14 = vector.load %arg4[%c0_4, %c0_5, %c0_6] : memref<1x8x128xf32, #tpu.memory_space<vmem>>, vector<1x8x128xf32>
    %15 = vector.shape_cast %14 : vector<1x8x128xf32> to vector<8x128xf32>
    %16 = arith.addf %15, %13 : vector<8x128xf32>
    %c0_7 = arith.constant 0 : index
    %c0_8 = arith.constant 0 : index
    %c0_9 = arith.constant 0 : index
    %17 = vector.load %arg4[%c0_7, %c0_8, %c0_9] : memref<1x8x128xf32, #tpu.memory_space<vmem>>, vector<1x8x128xf32>
    %18 = vector.shape_cast %17 : vector<1x8x128xf32> to vector<8x128xf32>
    %19 = vector.shape_cast %16 : vector<8x128xf32> to vector<1x8x128xf32>
    tpu.vector_store %arg4[%c0_7, %c0_8, %c0_9], %19 {strides = array<i32>} : memref<1x8x128xf32, #tpu.memory_space<vmem>>, vector<1x8x128xf32>,
    return
  }
  func.func @transform_0(%arg0: i32, %arg1: i32) -> (i32, i32) {
    %c1_i32 = arith.constant 1 : i32
    %0 = arith.muli %arg0, %c1_i32 : i32
    %1 = arith.addi %0, %arg1 : i32
    %c0_i32 = arith.constant 0 : i32
    %c0_i32_0 = arith.constant 0 : i32
    return %1, %c0_i32 : i32, i32
  }
  func.func @transform_1(%arg0: i32, %arg1: i32) -> (i32, i32) {
    %c1_i32 = arith.constant 1 : i32
    %0 = arith.muli %arg0, %c1_i32 : i32
    %1 = arith.addi %0, %arg1 : i32
    %c0_i32 = arith.constant 0 : i32
    %c0_i32_0 = arith.constant 0 : i32
    return %1, %c0_i32 : i32, i32
  }
  func.func @transform_2(%arg0: i32, %arg1: i32) -> (i32, i32, i32) {
    %c0_i32 = arith.constant 0 : i32
    %c0_i32_0 = arith.constant 0 : i32
    %c0_i32_1 = arith.constant 0 : i32
    return %arg0, %c0_i32, %c0_i32_0 : i32, i32, i32
  }
}

</mosaic_0001>

<bundles_post_ra>
// kernel: tpu_custom_call.1
= control target key start
LH: loop header
LB: loop body
LE: loop exit
PB: predicated region body
PF: predicated region fallthrough
CT: control target
= control target key end

     0   :  { %7 = vsyncpa [#allocation3], 0  ;;  %s187_s0 = inlined_call_operand.hbm [shape: f32[16,128], index: 0, kind: input, shape index: {}]   ;;  %s188_s1 = inlined_call_operand.hbm [shape: f32[16,128], index: 1, kind: input, shape index: {}]   ;;  %s189_s2 = inlined_call_operand.hbm [shape: f32[1,8,128], index: 2, kind: output, shape index: {}]  }
   0x1   :  { %8 = vsyncpa [#allocation6], 0 }
   0x2   :  { %9 = vsyncpa [#allocation4], 0  ;;  %s158_s9 = smov [#allocation2]  }
   0x3   :  { %s19_s10 = sshll.u32 %s158_s9, 4  ;;  %s20_s10 = int_to_ptr.vmem [resolvable:$true] %s19_s10 }
   0x4   :  { %s100_s11 = scalar_lea.vmem %s20_s10, 256  ;;  %p105_p1 = scmp.lt.s32.totalorder %s20_s10, %s20_s10 }
   0x5   :  { %p101_p0 = scmp.ne.s32.totalorder %s20_s10, %s100_s11  ;;  %p106_p2 = scmp.lt.s32.totalorder %s100_s11, %s100_s11 }
   0x7   :  { %p107_p3 = por %p106_p2, %p105_p1 }
   0x9   :  { %p108_p4 = pnand %p107_p3, %p101_p0 }
   0xb   :  { %111 = shalt.err (!%p108_p4)
}
   0xc   :  { %s159_s12 = smov 128   ;;  %s160_s13 = smov 8  }
   0xd   :  { %25 = dma.hbm_to_vmem [thread:$0]  %s187_s0, 256, %s20_s10, [#allocation3], %s159_s12, %s159_s12, %s160_s13  }
   0xe   :  { %s161_s16 = smov [#allocation5]  }
   0xf   :  { %s35_s17 = sshll.u32 %s161_s16, 4  ;;  %s36_s17 = int_to_ptr.vmem [resolvable:$true] %s35_s17 }
  0x10   :  { %s120_s18 = scalar_lea.vmem %s36_s17, 256  ;;  %p125_p6 = scmp.lt.s32.totalorder %s36_s17, %s36_s17 }
  0x11   :  { %p121_p5 = scmp.ne.s32.totalorder %s36_s17, %s120_s18  ;;  %p126_p7 = scmp.lt.s32.totalorder %s120_s18, %s120_s18 }
  0x13   :  { %p127_p8 = por %p126_p7, %p125_p6 }
  0x15   :  { %p128_p9 = pnand %p127_p8, %p121_p5 }
  0x17   :  { %131 = shalt.err (!%p128_p9)
}
  0x18   :  { %41 = dma.hbm_to_vmem [thread:$0]  %s188_s1, 256, %s36_s17, [#allocation6], %s159_s12, %s159_s12, %s160_s13  }
  0x19   :  { %152 = dma.done.wait [#allocation3], 256  }
  0x1a   :  { %153 = vsyncadd [#allocation3], 4294967040 }
  0x1b   :  { %154 = dma.done.wait [#allocation6], 256  }
  0x1c   :  { %155 = vsyncadd [#allocation6], 4294967040  ;;  %v57_v0 = vld [vmem:[#allocation2] sm:$0xff]  ;;  %v58_v1 = vld [vmem:[#allocation2 + $0x8] sm:$0xff]  ;;  %s162_s0 = smov [#allocation7]  }
  0x1d   :  { %v59_v2 = vld [vmem:[#allocation5] sm:$0xff]  ;;  %v60_v3 = vld [vmem:[#allocation5 + $0x8] sm:$0xff]  ;;  %s76_s21 = sshll.u32 %s162_s0, 4  ;;  %s77_s21 = int_to_ptr.vmem [resolvable:$true] %s76_s21 }
  0x1e   :  { %v61_v4 = vsub.f32 %v57_v0, %v59_v2  ;;  %v62_v5 = vsub.f32 %v58_v1, %v60_v3  ;;  %s132_s22 = scalar_lea.vmem %s77_s21, 128  ;;  %p137_p11 = scmp.lt.s32.totalorder %s77_s21, %s77_s21 }
  0x1f   :  { %p133_p10 = scmp.ne.s32.totalorder %s77_s21, %s132_s22  ;;  %p138_p12 = scmp.lt.s32.totalorder %s132_s22, %s132_s22 }
  0x20   :  { %v63_v6 = vmul.f32 %v61_v4, %v61_v4  ;;  %v64_v7 = vmul.f32 %v62_v5, %v62_v5 }
  0x21   :  { %p139_p13 = por %p138_p12, %p137_p11 }
  0x22   :  { %v65_v8 = vadd.f32 %v64_v7, %v63_v6 }
  0x23   :  { %p140_p0 = pnand %p139_p13, %p133_p10 }
  0x24   :  { %69 = vst [vmem:[#allocation7] sm:$0xff] %v65_v8 }
  0x25   :  { %143 = shalt.err (!%p140_p0)
}
  0x26   :  { %79 = dma.vmem_to_hbm [thread:$0]  %s77_s21, 128, %s189_s2, [#allocation4]  }
  0x27   :  { %156 = dma.done.wait [#allocation4], 128  }
  0x28   :  { %157 = vsyncadd [#allocation4], 4294967168 }
  0x29   :  { %83 = vsyncpa [#allocation3], 1 }
  0x2a   :  { %84 = vsyncpa [#allocation6], 1 }
  0x2b   :  { %85 = vsyncpa [#allocation4], 1 }

</bundles_post_ra>
